<compile_context>
chip_gen: v6e
topology: v6e:2x2x1
jax: 0.10.0
libtpu: 0.0.40
codegen_flags: <defaults>
</compile_context>

<pallas_src>
import jax
import jax.numpy as jnp
from jax.experimental import pallas as pl
from jax.experimental.pallas import tpu as pltpu

B, S, D, FF, V = 2, 8, 32, 64, 64
C = 2                               # num classes
PAD_ID, BOS_ID = 1, 0
BS = B * S                          # 16 rows per branch
R = 2 * BS                          # 32 fused rows (branch-major)
D2, FF2, V2, C2 = 2 * D, 2 * FF, 2 * V, 2 * C
PB = 2 * B                          # pooled rows (branch-major)
OUT_LANES = 128

# weight-slab row offsets (all multiples of 16 -> aligned bf16 sublane packing)
_EMB = 0
_WQ = _EMB + V2        # 128
_WK = _WQ + D2         # 192
_WV = _WK + D2         # 256
_WO = _WV + D2         # 320
_W1 = _WO + D2         # 384
_W2 = _W1 + D2         # 448
_HW = _W2 + FF2        # 576
_WROWS = _HW + D2      # 640


# ---------------------------------------------------------------------------
# The single fused kernel
# ---------------------------------------------------------------------------
def fused_model_kernel(int_ref, w_ref, aux_ref, out_ref):
    f32, bf16 = jnp.float32, jnp.bfloat16

    sub_r = jax.lax.broadcasted_iota(jnp.int32, (R, 1), 0)
    lane_v = jax.lax.broadcasted_iota(jnp.int32, (1, V2), 1)
    lane_d = jax.lax.broadcasted_iota(jnp.int32, (1, D2), 1)
    lane_f = jax.lax.broadcasted_iota(jnp.int32, (1, FF2), 1)
    is_br1 = sub_r >= BS
    # quadrant masks: branch-0 rows live in lanes [0:D)/[0:FF), branch-1 in the rest
    m_d = (is_br1 == (lane_d >= D)).astype(f32)        # (R, D2)
    m_ff = (is_br1 == (lane_f >= FF)).astype(f32)       # (R, FF2)

    # ---- embedding lookup: one vectorized one-hot compare + one MXU matmul --
    tok = int_ref[0:R, :]                                # (R, 1) int32
    tgt = tok + jnp.where(is_br1, V, 0)                  # branch-1 ids -> cols V:2V
    onehot = (lane_v == tgt).astype(bf16)                # (R, V2)
    x = jnp.dot(onehot, w_ref[_EMB:_EMB + V2, 0:D2],
                preferred_element_type=f32)              # (R, D2) quadrant layout

    # ---- self-attention: block-diagonal projections, one fused score matmul -
    xb = x.astype(bf16)
    q = jnp.dot(xb, w_ref[_WQ:_WQ + D2, 0:D2], preferred_element_type=f32)
    k = jnp.dot(xb, w_ref[_WK:_WK + D2, 0:D2], preferred_element_type=f32)
    v = jnp.dot(xb, w_ref[_WV:_WV + D2, 0:D2], preferred_element_type=f32)

    scores = jax.lax.dot_general(q.astype(bf16), k.astype(bf16),
                                 (((1,), (1,)), ((), ())),
                                 preferred_element_type=f32)          # (R, R)
    # host-built bias: -1e9 on cross-(branch,batch) blocks and on PAD keys
    scores = scores * (1.0 / float(D) ** 0.5) + aux_ref[0:R, 0:R]
    scores = scores - jnp.max(scores, axis=-1, keepdims=True)
    p = jnp.exp(scores)
    p = p * pl.reciprocal(jnp.sum(p, axis=-1, keepdims=True), approx=True)
    ctx = jnp.dot(p.astype(bf16), v.astype(bf16), preferred_element_type=f32)
    attn = jnp.dot(ctx.astype(bf16), w_ref[_WO:_WO + D2, 0:D2],
                   preferred_element_type=f32)

    def layernorm(h, g, be):
        # h is quadrant-clean (D real features per row, rest exactly 0)
        mu = jnp.sum(h, axis=-1, keepdims=True) * (1.0 / D)
        c = (h - mu) * m_d
        var = jnp.sum(c * c, axis=-1, keepdims=True) * (1.0 / D)
        return (c * jax.lax.rsqrt(var + 1e-5) * g + be) * m_d

    h = layernorm(x + attn, aux_ref[32:33, 0:D2], aux_ref[32:33, D2:2 * D2])

    # ---- FFN: block-diagonal, both branches in one matmul pair --------------
    ff = jnp.dot(h.astype(bf16), w_ref[_W1:_W1 + D2, 0:FF2],
                 preferred_element_type=f32)
    ff = jnp.maximum(ff + aux_ref[34:35, 0:FF2], 0.0) * m_ff
    ff = (jnp.dot(ff.astype(bf16), w_ref[_W2:_W2 + FF2, 0:D2],
                  preferred_element_type=f32) + aux_ref[35:36, 0:D2]) * m_d
    h2 = layernorm(h + ff, aux_ref[33:34, 0:D2], aux_ref[33:34, D2:2 * D2])

    # ---- <s>-token pooling: one select-matrix matmul (both branches) --------
    pooled = jnp.dot(aux_ref[0:PB, R:2 * R], h2,
                     preferred_element_type=f32)          # (PB, D2)

    # ---- classification heads folded into one block-diagonal matmul ---------
    logits = jnp.dot(pooled.astype(bf16), w_ref[_HW:_HW + D2, 0:C2],
                     preferred_element_type=f32) + aux_ref[36:37, 0:C2]  # (PB, C2)

    lane_c = jax.lax.broadcasted_iota(jnp.int32, (1, C2), 1)
    sub_p = jax.lax.broadcasted_iota(jnp.int32, (PB, 1), 0)
    m_head = (sub_p >= B) == (lane_c >= C)                # allowed class quadrant
    lab1h = (lane_c == int_ref[R:R + PB, :]).astype(f32)  # label one-hot (PB, C2)

    z = jnp.where(m_head, logits, jnp.float32(-1e30))
    zmax = jnp.max(z, axis=-1, keepdims=True)
    e = jnp.where(m_head, jnp.exp(z - zmax), 0.0)
    denom = jnp.sum(e, axis=-1, keepdims=True)
    prob = e / denom                                      # per-branch softmax probs
    logp = (z - zmax) - jnp.log(denom)
    nll = -jnp.sum(lab1h * logp, axis=-1, keepdims=True)  # (PB, 1)
    loss = jnp.sum(nll, axis=0, keepdims=True) * (1.0 / (2 * B))  # 0.5*(ce0+ce1)

    fused_prob = 0.5 * (prob[0:B, 0:C] + prob[B:PB, C:C2])        # (B, C)

    # ---- lane-dense output slab: [prob_0, prob_1, loss, 0 ...] --------------
    lane_o = jax.lax.broadcasted_iota(jnp.int32, (1, OUT_LANES), 1)
    slab = jnp.where(lane_o == 0, fused_prob[:, 0:1], 0.0)
    slab = slab + jnp.where(lane_o == 1, fused_prob[:, 1:2], 0.0)
    slab = slab + jnp.where(lane_o == C, loss, 0.0)
    out_ref[...] = slab


# ---------------------------------------------------------------------------
# Host-side packing helpers
# ---------------------------------------------------------------------------
def _blockdiag(a, b):
    m, n = a.shape
    z = jnp.zeros((m, n), a.dtype)
    return jnp.concatenate(
        [jnp.concatenate([a, z], axis=1), jnp.concatenate([z, b], axis=1)], axis=0)


def _pad_cols(a, width=128):
    m, n = a.shape
    if n == width:
        return a
    return jnp.concatenate([a, jnp.zeros((m, width - n), a.dtype)], axis=1)


def pack_weight_slab(p):
    """All block-diagonal matmul weights in one bf16 (640, 128) slab."""
    rows = []
    for nm in ('emb', 'wq', 'wk', 'wv', 'wo', 'w1', 'w2', 'hw'):
        bd = _blockdiag(p[nm][0], p[nm][1]).astype(jnp.bfloat16)
        rows.append(_pad_cols(bd))
    slab = jnp.concatenate(rows, axis=0)
    assert slab.shape == (_WROWS, 128)
    return slab


def _build_inputs(input_ids, input_ids_2, labels, p):
    ids_all = jnp.concatenate(
        [input_ids.reshape(-1), input_ids_2.reshape(-1)]).astype(jnp.int32)   # (R,)

    # fused attention bias: same-(branch,batch) block mask + PAD key penalty
    grp = jnp.arange(R, dtype=jnp.int32) // S
    allowed = grp[:, None] == grp[None, :]
    pad_pen = jnp.where(ids_all == PAD_ID, -1e9, 0.0).astype(jnp.float32)
    attn_bias = jnp.where(allowed, 0.0, -1e9).astype(jnp.float32) + pad_pen[None, :]

    # BOS select matrix (bos_mask is computed in Model.forward in the reference)
    bos1 = jnp.argmax(input_ids == BOS_ID, axis=1)
    bos2 = jnp.argmax(input_ids_2 == BOS_ID, axis=1)
    rowpos = jnp.concatenate([jnp.arange(B) * S + bos1,
                              BS + jnp.arange(B) * S + bos2]).astype(jnp.int32)
    sel = (jnp.arange(R)[None, :] == rowpos[:, None]).astype(jnp.float32)      # (PB, R)

    aux = jnp.zeros((40, 128), jnp.float32)
    aux = aux.at[0:R, 0:R].set(attn_bias)
    aux = aux.at[0:PB, R:2 * R].set(sel)
    aux = aux.at[32, 0:D2].set(jnp.concatenate([p['g1'][0], p['g1'][1]]))
    aux = aux.at[32, D2:2 * D2].set(jnp.concatenate([p['be1'][0], p['be1'][1]]))
    aux = aux.at[33, 0:D2].set(jnp.concatenate([p['g2'][0], p['g2'][1]]))
    aux = aux.at[33, D2:2 * D2].set(jnp.concatenate([p['be2'][0], p['be2'][1]]))
    aux = aux.at[34, 0:FF2].set(jnp.concatenate([p['b1'][0], p['b1'][1]]))
    aux = aux.at[35, 0:D2].set(jnp.concatenate([p['b2'][0], p['b2'][1]]))
    aux = aux.at[36, 0:C2].set(jnp.concatenate([p['hb'][0], p['hb'][1]]))

    labc = jnp.concatenate([labels.astype(jnp.int32), C + labels.astype(jnp.int32)])
    ints = jnp.zeros((40, 1), jnp.int32)
    ints = ints.at[0:R, 0].set(ids_all)
    ints = ints.at[R:R + PB, 0].set(labc)
    return ints, aux


# ---------------------------------------------------------------------------
# Wrapper: one pallas_call for the whole forward
# ---------------------------------------------------------------------------
def fused_forward(ints, wslab, aux):
    vmem = pl.BlockSpec(memory_space=pltpu.MemorySpace.VMEM)
    return pl.pallas_call(
        fused_model_kernel,
        in_specs=[vmem, vmem, vmem],
        out_specs=vmem,
        out_shape=jax.ShapeDtypeStruct((B, OUT_LANES), jnp.float32),
    )(ints, wslab, aux)


def _check_bos_counts(ids):
    # Host-side equivalent of the PyTorch ValueError (data-dependent control flow).
    counts = jax.device_get(jnp.sum(ids == BOS_ID, axis=1))
    if len(set(int(c) for c in counts)) > 1:
        raise ValueError('All examples must have the same number of <eos> tokens.')


def model_forward(input_ids, input_ids_2, labels, params, wslab=None):
    _check_bos_counts(input_ids)
    _check_bos_counts(input_ids_2)
    if wslab is None:
        wslab = pack_weight_slab(params)
    ints, aux = _build_inputs(input_ids, input_ids_2, labels, params)
    slab = fused_forward(ints, wslab, aux)
    fused_prob = slab[:B, :C]
    loss = slab[0, C]
    return loss, fused_prob


# ---------------------------------------------------------------------------
# Deterministic parameter init (matmul weights bf16, biases/LN f32)
# ---------------------------------------------------------------------------
def init_params(key):
    ks = jax.random.split(key, 16)

    def dense(k, shape):
        return (jax.random.normal(k, shape, jnp.float32) * 0.02).astype(jnp.bfloat16)

    names = ('emb', 'wq', 'wk', 'wv', 'wo', 'w1', 'w2', 'hw')
    shapes = ((V, D), (D, D), (D, D), (D, D), (D, D), (D, FF), (FF, D), (D, C))
    p = {nm: jnp.stack([dense(ks[2 * i], sh), dense(ks[2 * i + 1], sh)])
         for i, (nm, sh) in enumerate(zip(names, shapes))}
    p['b1'] = jnp.zeros((2, FF), jnp.float32)
    p['b2'] = jnp.zeros((2, D), jnp.float32)
    p['g1'] = jnp.ones((2, D), jnp.float32)
    p['be1'] = jnp.zeros((2, D), jnp.float32)
    p['g2'] = jnp.ones((2, D), jnp.float32)
    p['be2'] = jnp.zeros((2, D), jnp.float32)
    p['hb'] = jnp.zeros((2, C), jnp.float32)
    return p


if __name__ == "__main__":
    key = jax.random.PRNGKey(0)
    pk, ik1, ik2 = jax.random.split(key, 3)
    params = init_params(pk)
    wslab = pack_weight_slab(params)

    toks1 = jax.random.randint(ik1, (B, S), 2, V, dtype=jnp.int32)
    toks2 = jax.random.randint(ik2, (B, S), 2, V, dtype=jnp.int32)
    # exactly one <s> (bos) token per example, some padding to exercise the mask
    input_ids = toks1.at[:, 0].set(BOS_ID).at[0, S - 2:].set(PAD_ID)
    input_ids_2 = toks2.at[:, 0].set(BOS_ID).at[1, S - 1:].set(PAD_ID)
    labels = jnp.array([0, 1], dtype=jnp.int32)

    loss, fused_prob = model_forward(input_ids, input_ids_2, labels, params, wslab)
    jax.block_until_ready((loss, fused_prob))
    assert fused_prob.shape == (B, C)
    assert loss.shape == ()
    print("KERNEL_OK")
</pallas_src>

<mosaic_0001>
module attributes {stable_mosaic.version = 11 : i64} {
  func.func @fused_model_kernel(%arg0: memref<40x1xi32, #tpu.memory_space<vmem>>, %arg1: memref<640x128xbf16, #tpu.memory_space<vmem>>, %arg2: memref<40x128xf32, #tpu.memory_space<vmem>>, %arg3: memref<2x128xf32, #tpu.memory_space<vmem>>) attributes {dimension_semantics = [], scalar_prefetch = 0 : i64, scratch_operands = 0 : i64, tpu.core_type = #tpu.core_type<tc>} {
    %0 = tpu.iota {dimensions = array<i32: 0>} : vector<32x1xi32>
    %1 = tpu.iota {dimensions = array<i32: 1>} : vector<1x128xi32>
    %2 = tpu.iota {dimensions = array<i32: 1>} : vector<1x64xi32>
    %3 = tpu.iota {dimensions = array<i32: 1>} : vector<1x128xi32>
    %c16_i32 = arith.constant 16 : i32
    %4 = vector.broadcast %c16_i32 : i32 to vector<32x1xi32>
    %5 = arith.cmpi sge, %0, %4 : vector<32x1xi32>
    %c32_i32 = arith.constant 32 : i32
    %6 = vector.broadcast %c32_i32 : i32 to vector<1x64xi32>
    %7 = arith.cmpi sge, %2, %6 : vector<1x64xi32>
    %8 = vector.broadcast %5 : vector<32x1xi1> to vector<32x64xi1>
    %9 = vector.broadcast %7 : vector<1x64xi1> to vector<32x64xi1>
    %10 = vector.broadcast %8 : vector<32x64xi1> to vector<32x64xi1>
    %11 = vector.broadcast %9 : vector<32x64xi1> to vector<32x64xi1>
    %12 = arith.xori %10, %11 : vector<32x64xi1>
    %cst = arith.constant dense<true> : vector<32x64xi1>
    %13 = arith.xori %12, %cst : vector<32x64xi1>
    %14 = arith.extui %13 : vector<32x64xi1> to vector<32x64xi32>
    %15 = arith.sitofp %14 : vector<32x64xi32> to vector<32x64xf32>
    %c64_i32 = arith.constant 64 : i32
    %16 = vector.broadcast %c64_i32 : i32 to vector<1x128xi32>
    %17 = arith.cmpi sge, %3, %16 : vector<1x128xi32>
    %18 = vector.broadcast %5 : vector<32x1xi1> to vector<32x128xi1>
    %19 = vector.broadcast %17 : vector<1x128xi1> to vector<32x128xi1>
    %20 = vector.broadcast %18 : vector<32x128xi1> to vector<32x128xi1>
    %21 = vector.broadcast %19 : vector<32x128xi1> to vector<32x128xi1>
    %22 = arith.xori %20, %21 : vector<32x128xi1>
    %cst_0 = arith.constant dense<true> : vector<32x128xi1>
    %23 = arith.xori %22, %cst_0 : vector<32x128xi1>
    %24 = arith.extui %23 : vector<32x128xi1> to vector<32x128xi32>
    %25 = arith.sitofp %24 : vector<32x128xi32> to vector<32x128xf32>
    %c0 = arith.constant 0 : index
    %c0_1 = arith.constant 0 : index
    %26 = vector.load %arg0[%c0, %c0_1] : memref<40x1xi32, #tpu.memory_space<vmem>>, vector<32x1xi32>
    %c64_i32_2 = arith.constant 64 : i32
    %c0_i32 = arith.constant 0 : i32
    %27 = vector.broadcast %c64_i32_2 : i32 to vector<32x1xi32>
    %28 = vector.broadcast %c0_i32 : i32 to vector<32x1xi32>
    %29 = arith.select %5, %27, %28 : vector<32x1xi1>, vector<32x1xi32>
    %30 = arith.addi %26, %29 : vector<32x1xi32>
    %31 = vector.broadcast %1 : vector<1x128xi32> to vector<32x128xi32>
    %32 = vector.broadcast %30 : vector<32x1xi32> to vector<32x128xi32>
    %33 = arith.cmpi eq, %31, %32 : vector<32x128xi32>
    %34 = arith.extui %33 : vector<32x128xi1> to vector<32x128xi32>
    %35 = arith.sitofp %34 : vector<32x128xi32> to vector<32x128xf32>
    %36 = arith.truncf %35 : vector<32x128xf32> to vector<32x128xbf16>
    %c0_3 = arith.constant 0 : index
    %c0_4 = arith.constant 0 : index
    %37 = vector.load %arg1[%c0_3, %c0_4] : memref<640x128xbf16, #tpu.memory_space<vmem>>, vector<128x64xbf16>
    %cst_5 = arith.constant dense<0.000000e+00> : vector<32x64xf32>
    %38 = tpu.matmul %36, %37, %cst_5 {dimension_numbers = #tpu.dot_dimension_numbers<[1], [0], [0], [1], [0, 0, 1, 1], [], []>} : vector<32x128xbf16>, vector<128x64xbf16>, vector<32x64xf32> -> vector<32x64xf32>
    %39 = arith.truncf %38 : vector<32x64xf32> to vector<32x64xbf16>
    %c128 = arith.constant 128 : index
    %c0_6 = arith.constant 0 : index
    %40 = vector.load %arg1[%c128, %c0_6] : memref<640x128xbf16, #tpu.memory_space<vmem>>, vector<64x64xbf16>
    %cst_7 = arith.constant dense<0.000000e+00> : vector<32x64xf32>
    %41 = tpu.matmul %39, %40, %cst_7 {dimension_numbers = #tpu.dot_dimension_numbers<[1], [0], [0], [1], [0, 0, 1, 1], [], []>} : vector<32x64xbf16>, vector<64x64xbf16>, vector<32x64xf32> -> vector<32x64xf32>
    %c192 = arith.constant 192 : index
    %c0_8 = arith.constant 0 : index
    %42 = vector.load %arg1[%c192, %c0_8] : memref<640x128xbf16, #tpu.memory_space<vmem>>, vector<64x64xbf16>
    %cst_9 = arith.constant dense<0.000000e+00> : vector<32x64xf32>
    %43 = tpu.matmul %39, %42, %cst_9 {dimension_numbers = #tpu.dot_dimension_numbers<[1], [0], [0], [1], [0, 0, 1, 1], [], []>} : vector<32x64xbf16>, vector<64x64xbf16>, vector<32x64xf32> -> vector<32x64xf32>
    %c256 = arith.constant 256 : index
    %c0_10 = arith.constant 0 : index
    %44 = vector.load %arg1[%c256, %c0_10] : memref<640x128xbf16, #tpu.memory_space<vmem>>, vector<64x64xbf16>
    %cst_11 = arith.constant dense<0.000000e+00> : vector<32x64xf32>
    %45 = tpu.matmul %39, %44, %cst_11 {dimension_numbers = #tpu.dot_dimension_numbers<[1], [0], [0], [1], [0, 0, 1, 1], [], []>} : vector<32x64xbf16>, vector<64x64xbf16>, vector<32x64xf32> -> vector<32x64xf32>
    %46 = arith.truncf %41 : vector<32x64xf32> to vector<32x64xbf16>
    %47 = arith.truncf %43 : vector<32x64xf32> to vector<32x64xbf16>
    %cst_12 = arith.constant dense<0.000000e+00> : vector<32x32xf32>
    %48 = tpu.matmul %46, %47, %cst_12 {dimension_numbers = #tpu.dot_dimension_numbers<[1], [1], [0], [0], [0, 0, 1, 0], [], []>} : vector<32x64xbf16>, vector<32x64xbf16>, vector<32x32xf32> -> vector<32x32xf32>
    %cst_13 = arith.constant 0.176776692 : f32
    %49 = vector.broadcast %cst_13 : f32 to vector<32x32xf32>
    %50 = arith.mulf %48, %49 : vector<32x32xf32>
    %c0_14 = arith.constant 0 : index
    %c0_15 = arith.constant 0 : index
    %51 = vector.load %arg2[%c0_14, %c0_15] : memref<40x128xf32, #tpu.memory_space<vmem>>, vector<32x32xf32>
    %52 = arith.addf %50, %51 : vector<32x32xf32>
    %cst_16 = arith.constant dense<0xFF800000> : vector<32xf32>
    %53 = vector.multi_reduction <maximumf>, %52, %cst_16 [1] : vector<32x32xf32> to vector<32xf32>
    %54 = vector.shape_cast %53 : vector<32xf32> to vector<32x1xf32>
    %55 = vector.broadcast %54 : vector<32x1xf32> to vector<32x32xf32>
    %56 = arith.subf %52, %55 : vector<32x32xf32>
    %57 = math.exp %56 : vector<32x32xf32>
    %cst_17 = arith.constant dense<0.000000e+00> : vector<32xf32>
    %58 = vector.multi_reduction <add>, %57, %cst_17 [1] : vector<32x32xf32> to vector<32xf32>
    %59 = vector.shape_cast %58 : vector<32xf32> to vector<32x1xf32>
    %60 = tpu.reciprocal %59 {approx = true} : vector<32x1xf32> -> vector<32x1xf32>
    %61 = vector.broadcast %60 : vector<32x1xf32> to vector<32x32xf32>
    %62 = arith.mulf %57, %61 : vector<32x32xf32>
    %63 = arith.truncf %62 : vector<32x32xf32> to vector<32x32xbf16>
    %64 = arith.truncf %45 : vector<32x64xf32> to vector<32x64xbf16>
    %cst_18 = arith.constant dense<0.000000e+00> : vector<32x64xf32>
    %65 = tpu.matmul %63, %64, %cst_18 {dimension_numbers = #tpu.dot_dimension_numbers<[1], [0], [0], [1], [0, 0, 1, 1], [], []>} : vector<32x32xbf16>, vector<32x64xbf16>, vector<32x64xf32> -> vector<32x64xf32>
    %66 = arith.truncf %65 : vector<32x64xf32> to vector<32x64xbf16>
    %c320 = arith.constant 320 : index
    %c0_19 = arith.constant 0 : index
    %67 = vector.load %arg1[%c320, %c0_19] : memref<640x128xbf16, #tpu.memory_space<vmem>>, vector<64x64xbf16>
    %cst_20 = arith.constant dense<0.000000e+00> : vector<32x64xf32>
    %68 = tpu.matmul %66, %67, %cst_20 {dimension_numbers = #tpu.dot_dimension_numbers<[1], [0], [0], [1], [0, 0, 1, 1], [], []>} : vector<32x64xbf16>, vector<64x64xbf16>, vector<32x64xf32> -> vector<32x64xf32>
    %69 = arith.addf %38, %68 : vector<32x64xf32>
    %c32 = arith.constant 32 : index
    %c0_21 = arith.constant 0 : index
    %70 = vector.load %arg2[%c32, %c0_21] : memref<40x128xf32, #tpu.memory_space<vmem>>, vector<1x64xf32>
    %c32_22 = arith.constant 32 : index
    %c64 = arith.constant 64 : index
    %71 = vector.load %arg2[%c32_22, %c64] : memref<40x128xf32, #tpu.memory_space<vmem>>, vector<1x64xf32>
    %cst_23 = arith.constant dense<0.000000e+00> : vector<32xf32>
    %72 = vector.multi_reduction <add>, %69, %cst_23 [1] : vector<32x64xf32> to vector<32xf32>
    %73 = vector.shape_cast %72 : vector<32xf32> to vector<32x1xf32>
    %cst_24 = arith.constant 3.125000e-02 : f32
    %74 = vector.broadcast %cst_24 : f32 to vector<32x1xf32>
    %75 = arith.mulf %73, %74 : vector<32x1xf32>
    %76 = vector.broadcast %75 : vector<32x1xf32> to vector<32x64xf32>
    %77 = arith.subf %69, %76 : vector<32x64xf32>
    %78 = arith.mulf %77, %15 : vector<32x64xf32>
    %79 = arith.mulf %78, %78 : vector<32x64xf32>
    %cst_25 = arith.constant dense<0.000000e+00> : vector<32xf32>
    %80 = vector.multi_reduction <add>, %79, %cst_25 [1] : vector<32x64xf32> to vector<32xf32>
    %81 = vector.shape_cast %80 : vector<32xf32> to vector<32x1xf32>
    %cst_26 = arith.constant 3.125000e-02 : f32
    %82 = vector.broadcast %cst_26 : f32 to vector<32x1xf32>
    %83 = arith.mulf %81, %82 : vector<32x1xf32>
    %cst_27 = arith.constant 9.99999974E-6 : f32
    %84 = vector.broadcast %cst_27 : f32 to vector<32x1xf32>
    %85 = arith.addf %83, %84 : vector<32x1xf32>
    %86 = math.rsqrt %85 : vector<32x1xf32>
    %87 = vector.broadcast %86 : vector<32x1xf32> to vector<32x64xf32>
    %88 = arith.mulf %78, %87 : vector<32x64xf32>
    %89 = vector.broadcast %70 : vector<1x64xf32> to vector<32x64xf32>
    %90 = arith.mulf %88, %89 : vector<32x64xf32>
    %91 = vector.broadcast %71 : vector<1x64xf32> to vector<32x64xf32>
    %92 = arith.addf %90, %91 : vector<32x64xf32>
    %93 = arith.mulf %92, %15 : vector<32x64xf32>
    %94 = arith.truncf %93 : vector<32x64xf32> to vector<32x64xbf16>
    %c384 = arith.constant 384 : index
    %c0_28 = arith.constant 0 : index
    %95 = vector.load %arg1[%c384, %c0_28] : memref<640x128xbf16, #tpu.memory_space<vmem>>, vector<64x128xbf16>
    %cst_29 = arith.constant dense<0.000000e+00> : vector<32x128xf32>
    %96 = tpu.matmul %94, %95, %cst_29 {dimension_numbers = #tpu.dot_dimension_numbers<[1], [0], [0], [1], [0, 0, 1, 1], [], []>} : vector<32x64xbf16>, vector<64x128xbf16>, vector<32x128xf32> -> vector<32x128xf32>
    %c34 = arith.constant 34 : index
    %c0_30 = arith.constant 0 : index
    %97 = vector.load %arg2[%c34, %c0_30] : memref<40x128xf32, #tpu.memory_space<vmem>>, vector<1x128xf32>
    %98 = vector.broadcast %97 : vector<1x128xf32> to vector<32x128xf32>
    %99 = arith.addf %96, %98 : vector<32x128xf32>
    %cst_31 = arith.constant 0.000000e+00 : f32
    %100 = vector.broadcast %cst_31 : f32 to vector<32x128xf32>
    %101 = arith.maximumf %99, %100 : vector<32x128xf32>
    %102 = arith.mulf %101, %25 : vector<32x128xf32>
    %103 = arith.truncf %102 : vector<32x128xf32> to vector<32x128xbf16>
    %c448 = arith.constant 448 : index
    %c0_32 = arith.constant 0 : index
    %104 = vector.load %arg1[%c448, %c0_32] : memref<640x128xbf16, #tpu.memory_space<vmem>>, vector<128x64xbf16>
    %cst_33 = arith.constant dense<0.000000e+00> : vector<32x64xf32>
    %105 = tpu.matmul %103, %104, %cst_33 {dimension_numbers = #tpu.dot_dimension_numbers<[1], [0], [0], [1], [0, 0, 1, 1], [], []>} : vector<32x128xbf16>, vector<128x64xbf16>, vector<32x64xf32> -> vector<32x64xf32>
    %c35 = arith.constant 35 : index
    %c0_34 = arith.constant 0 : index
    %106 = vector.load %arg2[%c35, %c0_34] : memref<40x128xf32, #tpu.memory_space<vmem>>, vector<1x64xf32>
    %107 = vector.broadcast %106 : vector<1x64xf32> to vector<32x64xf32>
    %108 = arith.addf %105, %107 : vector<32x64xf32>
    %109 = arith.mulf %108, %15 : vector<32x64xf32>
    %110 = arith.addf %93, %109 : vector<32x64xf32>
    %c33 = arith.constant 33 : index
    %c0_35 = arith.constant 0 : index
    %111 = vector.load %arg2[%c33, %c0_35] : memref<40x128xf32, #tpu.memory_space<vmem>>, vector<1x64xf32>
    %c33_36 = arith.constant 33 : index
    %c64_37 = arith.constant 64 : index
    %112 = vector.load %arg2[%c33_36, %c64_37] : memref<40x128xf32, #tpu.memory_space<vmem>>, vector<1x64xf32>
    %cst_38 = arith.constant dense<0.000000e+00> : vector<32xf32>
    %113 = vector.multi_reduction <add>, %110, %cst_38 [1] : vector<32x64xf32> to vector<32xf32>
    %114 = vector.shape_cast %113 : vector<32xf32> to vector<32x1xf32>
    %cst_39 = arith.constant 3.125000e-02 : f32
    %115 = vector.broadcast %cst_39 : f32 to vector<32x1xf32>
    %116 = arith.mulf %114, %115 : vector<32x1xf32>
    %117 = vector.broadcast %116 : vector<32x1xf32> to vector<32x64xf32>
    %118 = arith.subf %110, %117 : vector<32x64xf32>
    %119 = arith.mulf %118, %15 : vector<32x64xf32>
    %120 = arith.mulf %119, %119 : vector<32x64xf32>
    %cst_40 = arith.constant dense<0.000000e+00> : vector<32xf32>
    %121 = vector.multi_reduction <add>, %120, %cst_40 [1] : vector<32x64xf32> to vector<32xf32>
    %122 = vector.shape_cast %121 : vector<32xf32> to vector<32x1xf32>
    %cst_41 = arith.constant 3.125000e-02 : f32
    %123 = vector.broadcast %cst_41 : f32 to vector<32x1xf32>
    %124 = arith.mulf %122, %123 : vector<32x1xf32>
    %cst_42 = arith.constant 9.99999974E-6 : f32
    %125 = vector.broadcast %cst_42 : f32 to vector<32x1xf32>
    %126 = arith.addf %124, %125 : vector<32x1xf32>
    %127 = math.rsqrt %126 : vector<32x1xf32>
    %128 = vector.broadcast %127 : vector<32x1xf32> to vector<32x64xf32>
    %129 = arith.mulf %119, %128 : vector<32x64xf32>
    %130 = vector.broadcast %111 : vector<1x64xf32> to vector<32x64xf32>
    %131 = arith.mulf %129, %130 : vector<32x64xf32>
    %132 = vector.broadcast %112 : vector<1x64xf32> to vector<32x64xf32>
    %133 = arith.addf %131, %132 : vector<32x64xf32>
    %134 = arith.mulf %133, %15 : vector<32x64xf32>
    %c0_43 = arith.constant 0 : index
    %c32_44 = arith.constant 32 : index
    %135 = vector.load %arg2[%c0_43, %c32_44] : memref<40x128xf32, #tpu.memory_space<vmem>>, vector<4x32xf32>
    %cst_45 = arith.constant dense<0.000000e+00> : vector<4x64xf32>
    %136 = tpu.matmul %135, %134, %cst_45 {dimension_numbers = #tpu.dot_dimension_numbers<[1], [0], [0], [1], [0, 0, 1, 1], [], []>} : vector<4x32xf32>, vector<32x64xf32>, vector<4x64xf32> -> vector<4x64xf32>
    %137 = arith.truncf %136 : vector<4x64xf32> to vector<4x64xbf16>
    %c576 = arith.constant 576 : index
    %c0_46 = arith.constant 0 : index
    %138 = vector.load %arg1[%c576, %c0_46] : memref<640x128xbf16, #tpu.memory_space<vmem>>, vector<64x4xbf16>
    %cst_47 = arith.constant dense<0.000000e+00> : vector<4x4xf32>
    %139 = tpu.matmul %137, %138, %cst_47 {dimension_numbers = #tpu.dot_dimension_numbers<[1], [0], [0], [1], [0, 0, 1, 1], [], []>} : vector<4x64xbf16>, vector<64x4xbf16>, vector<4x4xf32> -> vector<4x4xf32>
    %c36 = arith.constant 36 : index
    %c0_48 = arith.constant 0 : index
    %140 = vector.load %arg2[%c36, %c0_48] : memref<40x128xf32, #tpu.memory_space<vmem>>, vector<1x4xf32>
    %141 = vector.broadcast %140 : vector<1x4xf32> to vector<4x4xf32>
    %142 = arith.addf %139, %141 : vector<4x4xf32>
    %143 = tpu.iota {dimensions = array<i32: 1>} : vector<1x4xi32>
    %144 = tpu.iota {dimensions = array<i32: 0>} : vector<4x1xi32>
    %c2_i32 = arith.constant 2 : i32
    %145 = vector.broadcast %c2_i32 : i32 to vector<4x1xi32>
    %146 = arith.cmpi sge, %144, %145 : vector<4x1xi32>
    %c2_i32_49 = arith.constant 2 : i32
    %147 = vector.broadcast %c2_i32_49 : i32 to vector<1x4xi32>
    %148 = arith.cmpi sge, %143, %147 : vector<1x4xi32>
    %149 = vector.broadcast %146 : vector<4x1xi1> to vector<4x4xi1>
    %150 = vector.broadcast %148 : vector<1x4xi1> to vector<4x4xi1>
    %151 = vector.broadcast %149 : vector<4x4xi1> to vector<4x4xi1>
    %152 = vector.broadcast %150 : vector<4x4xi1> to vector<4x4xi1>
    %153 = arith.xori %151, %152 : vector<4x4xi1>
    %cst_50 = arith.constant dense<true> : vector<4x4xi1>
    %154 = arith.xori %153, %cst_50 : vector<4x4xi1>
    %c32_51 = arith.constant 32 : index
    %c0_52 = arith.constant 0 : index
    %155 = vector.load %arg0[%c32_51, %c0_52] : memref<40x1xi32, #tpu.memory_space<vmem>>, vector<4x1xi32>
    %156 = vector.broadcast %143 : vector<1x4xi32> to vector<4x4xi32>
    %157 = vector.broadcast %155 : vector<4x1xi32> to vector<4x4xi32>
    %158 = arith.cmpi eq, %156, %157 : vector<4x4xi32>
    %159 = arith.extui %158 : vector<4x4xi1> to vector<4x4xi32>
    %160 = arith.sitofp %159 : vector<4x4xi32> to vector<4x4xf32>
    %cst_53 = arith.constant -1.000000e+30 : f32
    %161 = vector.broadcast %cst_53 : f32 to vector<4x4xf32>
    %162 = arith.select %154, %142, %161 : vector<4x4xi1>, vector<4x4xf32>
    %cst_54 = arith.constant dense<0xFF800000> : vector<4xf32>
    %163 = vector.multi_reduction <maximumf>, %162, %cst_54 [1] : vector<4x4xf32> to vector<4xf32>
    %164 = vector.shape_cast %163 : vector<4xf32> to vector<4x1xf32>
    %165 = vector.broadcast %164 : vector<4x1xf32> to vector<4x4xf32>
    %166 = arith.subf %162, %165 : vector<4x4xf32>
    %167 = math.exp %166 : vector<4x4xf32>
    %cst_55 = arith.constant 0.000000e+00 : f32
    %168 = vector.broadcast %cst_55 : f32 to vector<4x4xf32>
    %169 = arith.select %154, %167, %168 : vector<4x4xi1>, vector<4x4xf32>
    %cst_56 = arith.constant dense<0.000000e+00> : vector<4xf32>
    %170 = vector.multi_reduction <add>, %169, %cst_56 [1] : vector<4x4xf32> to vector<4xf32>
    %171 = vector.shape_cast %170 : vector<4xf32> to vector<4x1xf32>
    %172 = vector.broadcast %171 : vector<4x1xf32> to vector<4x4xf32>
    %173 = arith.divf %169, %172 : vector<4x4xf32>
    %174 = vector.broadcast %164 : vector<4x1xf32> to vector<4x4xf32>
    %175 = arith.subf %162, %174 : vector<4x4xf32>
    %176 = math.log %171 : vector<4x1xf32>
    %177 = vector.broadcast %176 : vector<4x1xf32> to vector<4x4xf32>
    %178 = arith.subf %175, %177 : vector<4x4xf32>
    %179 = arith.mulf %160, %178 : vector<4x4xf32>
    %cst_57 = arith.constant dense<0.000000e+00> : vector<4xf32>
    %180 = vector.multi_reduction <add>, %179, %cst_57 [1] : vector<4x4xf32> to vector<4xf32>
    %181 = vector.shape_cast %180 : vector<4xf32> to vector<4x1xf32>
    %cst_58 = arith.constant 0.000000e+00 : f32
    %182 = vector.broadcast %cst_58 : f32 to vector<4x1xf32>
    %183 = arith.subf %182, %181 : vector<4x1xf32>
    %cst_59 = arith.constant dense<0.000000e+00> : vector<1xf32>
    %184 = vector.multi_reduction <add>, %183, %cst_59 [0] : vector<4x1xf32> to vector<1xf32>
    %185 = vector.shape_cast %184 : vector<1xf32> to vector<1x1xf32>
    %cst_60 = arith.constant 2.500000e-01 : f32
    %186 = vector.broadcast %cst_60 : f32 to vector<1x1xf32>
    %187 = arith.mulf %185, %186 : vector<1x1xf32>
    %188 = vector.extract_strided_slice %173 {offsets = [0, 0], sizes = [2, 2], strides = [1, 1]} : vector<4x4xf32> to vector<2x2xf32>
    %189 = vector.extract_strided_slice %173 {offsets = [2, 2], sizes = [2, 2], strides = [1, 1]} : vector<4x4xf32> to vector<2x2xf32>
    %190 = arith.addf %188, %189 : vector<2x2xf32>
    %cst_61 = arith.constant 5.000000e-01 : f32
    %191 = vector.broadcast %cst_61 : f32 to vector<2x2xf32>
    %192 = arith.mulf %191, %190 : vector<2x2xf32>
    %193 = tpu.iota {dimensions = array<i32: 1>} : vector<1x128xi32>
    %c0_i32_62 = arith.constant 0 : i32
    %194 = vector.broadcast %c0_i32_62 : i32 to vector<1x128xi32>
    %195 = arith.cmpi eq, %193, %194 : vector<1x128xi32>
    %196 = vector.extract_strided_slice %192 {offsets = [0, 0], sizes = [2, 1], strides = [1, 1]} : vector<2x2xf32> to vector<2x1xf32>
    %cst_63 = arith.constant 0.000000e+00 : f32
    %197 = vector.shape_cast %195 : vector<1x128xi1> to vector<1x128xi1>
    %198 = vector.broadcast %197 : vector<1x128xi1> to vector<2x128xi1>
    %199 = vector.shape_cast %196 : vector<2x1xf32> to vector<2x1xf32>
    %200 = vector.broadcast %199 : vector<2x1xf32> to vector<2x128xf32>
    %201 = vector.broadcast %cst_63 : f32 to vector<2x128xf32>
    %202 = arith.select %198, %200, %201 : vector<2x128xi1>, vector<2x128xf32>
    %c1_i32 = arith.constant 1 : i32
    %203 = vector.broadcast %c1_i32 : i32 to vector<1x128xi32>
    %204 = arith.cmpi eq, %193, %203 : vector<1x128xi32>
    %205 = vector.extract_strided_slice %192 {offsets = [0, 1], sizes = [2, 1], strides = [1, 1]} : vector<2x2xf32> to vector<2x1xf32>
    %cst_64 = arith.constant 0.000000e+00 : f32
    %206 = vector.shape_cast %204 : vector<1x128xi1> to vector<1x128xi1>
    %207 = vector.broadcast %206 : vector<1x128xi1> to vector<2x128xi1>
    %208 = vector.shape_cast %205 : vector<2x1xf32> to vector<2x1xf32>
    %209 = vector.broadcast %208 : vector<2x1xf32> to vector<2x128xf32>
    %210 = vector.broadcast %cst_64 : f32 to vector<2x128xf32>
    %211 = arith.select %207, %209, %210 : vector<2x128xi1>, vector<2x128xf32>
    %212 = arith.addf %202, %211 : vector<2x128xf32>
    %c2_i32_65 = arith.constant 2 : i32
    %213 = vector.broadcast %c2_i32_65 : i32 to vector<1x128xi32>
    %214 = arith.cmpi eq, %193, %213 : vector<1x128xi32>
    %cst_66 = arith.constant 0.000000e+00 : f32
    %215 = vector.shape_cast %187 : vector<1x1xf32> to vector<1x1xf32>
    %216 = vector.broadcast %215 : vector<1x1xf32> to vector<1x128xf32>
    %217 = vector.broadcast %cst_66 : f32 to vector<1x128xf32>
    %218 = arith.select %214, %216, %217 : vector<1x128xi1>, vector<1x128xf32>
    %219 = vector.broadcast %218 : vector<1x128xf32> to vector<2x128xf32>
    %220 = arith.addf %212, %219 : vector<2x128xf32>
    %c0_67 = arith.constant 0 : index
    %c0_68 = arith.constant 0 : index
    %221 = vector.load %arg3[%c0_67, %c0_68] : memref<2x128xf32, #tpu.memory_space<vmem>>, vector<2x128xf32>
    tpu.vector_store %arg3[%c0_67, %c0_68], %220 {strides = array<i32>} : memref<2x128xf32, #tpu.memory_space<vmem>>, vector<2x128xf32>,
    return
  }
}

</mosaic_0001>

<bundles_post_ra>
// kernel: tpu_custom_call.1
= control target key start
LH: loop header
LB: loop body
LE: loop exit
PB: predicated region body
PF: predicated region fallthrough
CT: control target
= control target key end

     0   :  { %8 = vsyncpa [#allocation3], 0  ;;  %s2053_s0 = inlined_call_operand.vmem [shape: s32[40,1], index: 0, kind: input, shape index: {}]   ;;  %s2054_s1 = inlined_call_operand.hbm [shape: bf16[640,128], index: 1, kind: input, shape index: {}]   ;;  %s2055_s2 = inlined_call_operand.vmem [shape: f32[40,128], index: 2, kind: input, shape index: {}]   ;;  %s2056_s3 = inlined_call_operand.hbm [shape: f32[2,128], index: 3, kind: output, shape index: {}]  }
   0x1   :  { %9 = vsyncpa [#allocation4], 0  ;;  %s1819_s12 = smov [#allocation2]  }
   0x2   :  { %s17_s13 = sshll.u32 %s1819_s12, 4  ;;  %s18_s13 = int_to_ptr.vmem [resolvable:$true] %s17_s13 }
   0x3   :  { %s1783_s14 = scalar_lea.vmem %s18_s13, 5120  ;;  %p1788_p1 = scmp.lt.s32.totalorder %s18_s13, %s18_s13 }
   0x4   :  { %p1784_p0 = scmp.ne.s32.totalorder %s18_s13, %s1783_s14  ;;  %p1789_p2 = scmp.lt.s32.totalorder %s1783_s14, %s1783_s14 }
   0x6   :  { %p1790_p3 = por %p1789_p2, %p1788_p1 }
   0x8   :  { %p1791_p4 = pnand %p1790_p3, %p1784_p0 }
   0xa   :  { %1794 = shalt.err (!%p1791_p4)
}
   0xb   :  { %s1820_s15 = smov 64   ;;  %s1821_s16 = smov 4  }
   0xc   :  { %23 = dma.hbm_to_vmem [thread:$0]  %s2054_s1, 5120, %s18_s13, [#allocation3], %s1820_s15, %s1820_s15, %s1821_s16  }
   0xd   :  { %1815 = dma.done.wait [#allocation3], 5120  }
   0xe   :  { %1816 = vsyncadd [#allocation3], 4294962176  ;;  %v1822_v0 = vmov 0   ;;  %v87_v1 = vld [vmem:[%s2053_s0] sm:$0xff]  ;;  %v89_v2 = vld [vmem:[%s2053_s0 + $0x10] sm:$0xff]  ;;  %v30_v18 = vlaneseq  ;;  %vm272_vm6 = vcmask 523264  }
   0xf   :  { %1694 = vset.pattern.permute.xlu0 %v1822_v0  ;;  %1695 = vset.pattern.permute.xlu1 %v1822_v0  ;;  %v88_v3 = vld [vmem:[%s2053_s0 + $0x8] sm:$0xff]  ;;  %v97_v4 = vadd.s32 64, %v89_v2  ;;  %v90_v5 = vld [vmem:[%s2053_s0 + $0x18] sm:$0xff]  ;;  %v1698_v8 = vld [vmem:[#allocation2 + $0x30] sm:$0xff]   ;;  %v1823_v24 = vmov 1.0|1.0  }
  0x10   :  { %100 = vperm.xlu0 %1694, %v87_v1   ;;  %v1697_v6 = vld [vmem:[#allocation2 + $0x38] sm:$0xff]   ;;  %v98_v7 = vadd.s32 64, %v90_v5  ;;  %v1699_v9 = vld [vmem:[#allocation2 + $0x28] sm:$0xff]   ;;  %v1700_v10 = vld [vmem:[#allocation2 + $0x20] sm:$0xff]   ;;  %v1869_v20 = vand.u32 127, %v30_v18  ;;  %vm567_vm7 = vcmask 261120  }
  0x11   :  { %106 = vperm.xlu1 %1695, %v97_v4   ;;  %1541 = vmatprep.subr.bf16.mxu0 %v1697_v6  ;;  %v1705_v11 = vld [vmem:[#allocation2 + $0x58] sm:$0xff]   ;;  %v1707_v12 = vld [vmem:[#allocation2 + $0x50] sm:$0xff]   ;;  %v1703_v15 = vld [vmem:[#allocation2 + $0x8] sm:$0xff]   ;;  %vm1824_vm9 = vmmov 1   ;;  %s1826_s18 = smov 96  }
  0x12   :  { %1542 = vmatpush3.bf16.msra.mxu0 %v1697_v6  ;;  %1561 = vmatprep.subr.bf16.mxu1 %v1705_v11  ;;  %v1701_v13 = vld [vmem:[#allocation2 + $0x18] sm:$0xff]   ;;  %v1702_v14 = vld [vmem:[#allocation2 + $0x10] sm:$0xff]   ;;  %v1704_v16 = vld [vmem:[#allocation2] sm:$0xff]   ;;  %vm41_vm8 = vcmp.ge.s32.totalorder %v1869_v20, 32  ;;  %vm68_vm13 = vcmp.ge.s32.totalorder %v1869_v20, 64 }
  0x13   :  { %1543 = vmatprep.subr.bf16.mxu0 %v1698_v8  ;;  %1562 = vmatpush3.bf16.msra.mxu1 %v1705_v11  ;;  %v1706_v17 = vld [vmem:[#allocation2 + $0x98] sm:$0xff]   ;;  %v1708_v25 = vld [vmem:[#allocation2 + $0x90] sm:$0xff]   ;;  %v1709_v26 = vld [vmem:[#allocation2 + $0x48] sm:$0xff]  }
  0x14   :  { %103 = vperm.xlu0 %1694, %v88_v3   ;;  %1563 = vmatprep.subr.bf16.mxu1 %v1707_v12  ;;  %v1710_v27 = vld [vmem:[#allocation2 + $0x88] sm:$0xff]   ;;  %v1711_v28 = vld [vmem:[#allocation2 + $0x40] sm:$0xff]   ;;  %v1713_v30 = vld [vmem:[#allocation2 + $0x78] sm:$0xff]  }
  0x15   :  { %109 = vperm.xlu1 %1695, %v98_v7   ;;  %v1712_v29 = vld [vmem:[#allocation2 + $0x80] sm:$0xff]   ;;  %v1714_v37 = vld [vmem:[#allocation2 + $0x70] sm:$0xff]   ;;  %v1715_v38 = vld [vmem:[#allocation2 + $0x68] sm:$0xff]  }
  0x16   :  { %1544 = vmatpush3.bf16.msra.mxu0 %v1698_v8  ;;  %v1716_v39 = vld [vmem:[#allocation2 + $0x60] sm:$0xff]   ;;  %v561_v2 = vld [vmem:[%s2055_s2 + $0x10] sm:$0xff]  ;;  %v560_v5 = vld [vmem:[%s2055_s2 + $0x8] sm:$0xff] }
  0x17   :  { %1545 = vmatprep.subr.bf16.mxu0 %v1699_v9  ;;  %1564 = vmatpush3.bf16.msra.mxu1 %v1707_v12  ;;  %v559_v62 = vld [vmem:[%s2055_s2] sm:$0xff]  ;;  %vm54_vm10 = vmxor %vm1824_vm9, %vm41_vm8 }
  0x18   :  { %1565 = vmatprep.subr.bf16.mxu1 %v1709_v26  ;;  %vm56_vm11 = vmxor %vm41_vm8, %vm1824_vm9  ;;  %vm1342_vm8 = vcmask 1043456  }
  0x19   :  { %vm58_vm12 = vmxor %vm54_vm10, %vm1824_vm9  ;;  %vm1367_vm10 = vcmp.eq.s32.totalorder %v1869_v20, 1 }
  0x1a   :  { %1546 = vmatpush3.bf16.msra.mxu0 %v1699_v9  ;;  %vm73_vm14 = vmxor %vm1824_vm9, %vm68_vm13 }
  0x1b   :  { %1547 = vmatprep.subr.bf16.mxu0 %v1700_v10  ;;  %1566 = vmatpush3.bf16.msra.mxu1 %v1709_v26  ;;  %vm75_vm15 = vmxor %vm68_vm13, %vm1824_vm9 }
  0x1c   :  { %1567 = vmatprep.subr.bf16.mxu1 %v1711_v28 }
  0x1e   :  { %1548 = vmatpush3.bf16.msra.mxu0 %v1700_v10  ;;  %v562_v10 = vld [vmem:[%s2055_s2 + $0x18] sm:$0xff] }
  0x1f   :  { %1549 = vmatprep.subr.bf16.mxu0 %v1701_v13  ;;  %1568 = vmatpush3.bf16.msra.mxu1 %v1711_v28 }
  0x20   :  { %1573 = vmatprep.subr.bf16.mxu1 %v1713_v30 }
  0x22   :  { %1550 = vmatpush3.bf16.msra.mxu0 %v1701_v13 }
  0x23   :  { %1551 = vmatprep.subr.bf16.mxu0 %v1702_v14 }
  0x26   :  { %1552 = vmatpush3.bf16.msra.mxu0 %v1702_v14 }
  0x27   :  { %1553 = vmatprep.subr.bf16.mxu0 %v1703_v15 }
  0x2a   :  { %1554 = vmatpush3.bf16.msra.mxu0 %v1703_v15 }
  0x2b   :  { %1555 = vmatprep.subr.bf16.mxu0 %v1704_v16 }
  0x2e   :  { %1556 = vmatpush3.bf16.msra.mxu0 %v1704_v16 }
  0x2f   :  { %1585 = vmatprep.subr.bf16.mxu0 %v1706_v17 }
  0x8b   :  { %v101_v19 = vpop.permute.xlu0 %100 }
  0x8c   :  { %v107_v21 = vpop.permute.xlu1 %106  ;;  %vm111_vm0 = vcmp.eq.s32.totalorder %v1869_v20, %v101_v19 }
  0x8d   :  { %vm113_vm3 = vcmp.eq.s32.totalorder %v1869_v20, %v107_v21 }
  0x8f   :  { %v104_v22 = vpop.permute.xlu0 %103 }
  0x90   :  { %vm112_vm1 = vcmp.eq.s32.totalorder %v1869_v20, %v104_v22  ;;  %v110_v23 = vpop.permute.xlu1 %109 }
  0x91   :  { %vm1415_vm2 = vmpackc.low %vm112_vm1, %vm111_vm0  ;;  %vm114_vm4 = vcmp.eq.s32.totalorder %v1869_v20, %v110_v23  ;;  %vm1827_vm1 = vmmov 0  }
  0x92   :  { %1557 = vmatprep.mubr.msk.bf16.mxu0 %vm1415_vm2, %v1823_v24  ;;  %vm1417_vm5 = vmpackc.low %vm114_vm4, %vm113_vm3  ;;  %vm1306_vm3 = vcmp.ge.s32.totalorder %v1869_v20, 2 }
  0x93   :  { %1558 = vmatmul.mubr.msk.bf16.vlgmr.msra.gmra.mxu0 %vm1417_vm5, %v1823_v24  ;;  %vm77_vm0 = vmxor %vm73_vm14, %vm1824_vm9 }
  0x94   :  { %1586 = vmatpush3.bf16.msra.mxu0 %v1706_v17 }
  0x95   :  { %1587 = vmatprep.subr.bf16.mxu0 %v1708_v25 }
  0x98   :  { %1588 = vmatpush3.bf16.msra.mxu0 %v1708_v25 }
  0x99   :  { %1589 = vmatprep.subr.bf16.mxu0 %v1710_v27 }
  0x9c   :  { %1590 = vmatpush3.bf16.msra.mxu0 %v1710_v27 }
  0x9d   :  { %1591 = vmatprep.subr.bf16.mxu0 %v1712_v29 }
  0xa0   :  { %1592 = vmatpush3.bf16.msra.mxu0 %v1712_v29 }
 0x153   :  { %v1875_v31 = vpop.f32.mrf.mxu0 }
 0x155   :  { %v1877_v32 = vpop.f32.mrf.mxu0 }
 0x157   :  { %v1879_v33 = vpop.f32.mrf.mxu0 }
 0x158   :  { %v239_v36 = vpack.c.bf16 %v1879_v33, %v1875_v31 }
 0x159   :  { %v1881_v34 = vpop.f32.mrf.mxu0 }
 0x15a   :  { %v238_v35 = vpack.c.bf16 %v1881_v34, %v1877_v32 }
 0x15c   :  { %1569 = vmatprep.mubr.msk.bf16.mxu1 %vm272_vm6, %v238_v35  ;;  %1593 = vmatprep.mubr.msk.bf16.mxu0 %vm272_vm6, %v238_v35 }
 0x15d   :  { %1570 = vmatmul.mubr.msk.bf16.vlgmr.msra.gmra.mxu1 %vm272_vm6, %v239_v36  ;;  %1594 = vmatmul.mubr.msk.bf16.vlgmr.msra.gmra.mxu0 %vm272_vm6, %v239_v36 }
 0x15e   :  { %1574 = vmatpush3.bf16.msra.mxu1 %v1713_v30  ;;  %1581 = vmatprep.mubr.msk.bf16.mxu1 %vm272_vm6, %v238_v35 }
 0x15f   :  { %1575 = vmatprep.subr.bf16.mxu1 %v1714_v37 }
 0x162   :  { %1576 = vmatpush3.bf16.msra.mxu1 %v1714_v37 }
 0x163   :  { %1577 = vmatprep.subr.bf16.mxu1 %v1715_v38 }
 0x166   :  { %1578 = vmatpush3.bf16.msra.mxu1 %v1715_v38 }
 0x167   :  { %1579 = vmatprep.subr.bf16.mxu1 %v1716_v39 }
 0x16a   :  { %1580 = vmatpush3.bf16.msra.mxu1 %v1716_v39 }
 0x16d   :  { %1582 = vmatmul.mubr.msk.bf16.vlgmr.msra.gmra.mxu1 %vm272_vm6, %v239_v36 }
 0x21d   :  { %v1571_v40 = vpop.f32.mrf.mxu1  ;;  %v1595_v41 = vpop.f32.mrf.mxu0 }
 0x21f   :  { %v313_v42 = vpop.f32.mrf.mxu1  ;;  %v475_v43 = vpop.f32.mrf.mxu0 }
 0x221   :  { %v1572_v44 = vpop.f32.mrf.mxu1  ;;  %v1596_v45 = vpop.f32.mrf.mxu0 }
 0x222   :  { %v615_v46 = vpack.c.bf16 %v1596_v45, %v1595_v41  ;;  %v491_v59 = vpack.c.bf16 %v1572_v44, %v1571_v40 }
 0x223   :  { %v316_v47 = vpop.f32.mrf.mxu1  ;;  %v478_v48 = vpop.f32.mrf.mxu0 }
 0x224   :  { %v490_v49 = vpack.c.bf16 %v316_v47, %v313_v42  ;;  %v614_v50 = vpack.c.bf16 %v478_v48, %v475_v43  ;;  %1605 = vmatprep.subr.bf16.mxu0 %v615_v46  ;;  %v1717_v42 = vld [vmem:[#allocation2 + $0xb8] sm:$0xff]   ;;  %v1718_v43 = vld [vmem:[#allocation2 + $0xb0] sm:$0xff]  }
 0x225   :  { %1606 = vmatpush3.bf16.msra.mxu0 %v615_v46 }
 0x226   :  { %1601 = vmatprep.mubr.msk.bf16.mxu1 %vm272_vm6, %v490_v49  ;;  %1607 = vmatprep.subr.bf16.mxu0 %v614_v50 }
 0x229   :  { %1608 = vmatpush3.bf16.msra.mxu0 %v614_v50 }
 0x22d   :  { %v1583_v51 = vpop.f32.mrf.mxu1 }
 0x22f   :  { %v394_v52 = vpop.f32.mrf.mxu1 }
 0x231   :  { %v1584_v53 = vpop.f32.mrf.mxu1 }
 0x232   :  { %v493_v54 = vpack.c.bf16 %v1584_v53, %v1583_v51 }
 0x233   :  { %v397_v55 = vpop.f32.mrf.mxu1 }
 0x234   :  { %v504_v56 = vsel %vm272_vm6, %v493_v54, 0  ;;  %v492_v57 = vpack.c.bf16 %v397_v55, %v394_v52  ;;  %1680 = vmatprep.subr.msk.bf16.mxu1 %vm272_vm6, %v493_v54 }
 0x235   :  { %1598 = vmatpush3.bf16.xpose.msra.mxu1 %v504_v56 }
 0x236   :  { %1681 = vmatprep.subr.msk.bf16.mxu1 %vm272_vm6, %v492_v57  ;;  %v501_v58 = vsel %vm272_vm6, %v492_v57, 0 }
 0x23d   :  { %1600 = vmatpush3.bf16.xpose.msra.mxu1 %v501_v58  ;;  %v1719_v58 = vld [vmem:[#allocation2 + $0xa8] sm:$0xff]  }
 0x23e   :  { %1613 = vmatprep.subr.bf16.mxu1 %v1717_v42 }
 0x244   :  { %1602 = vmatmul.mubr.msk.bf16.vlgmr.msra.gmra.mxu1 %vm272_vm6, %v491_v59  ;;  %v1720_v59 = vld [vmem:[#allocation2 + $0xa0] sm:$0xff]  }
 0x245   :  { %1614 = vmatpush3.bf16.msra.mxu1 %v1717_v42 }
 0x246   :  { %1615 = vmatprep.subr.bf16.mxu1 %v1718_v43 }
 0x249   :  { %1616 = vmatpush3.bf16.msra.mxu1 %v1718_v43  ;;  %v1447_v43 = vld [vmem:[%s2055_s2 + $0x20] ss:$0 sm:$0xff] }
 0x24a   :  { %1617 = vmatprep.subr.bf16.mxu1 %v1719_v58 }
 0x24d   :  { %1618 = vmatpush3.bf16.msra.mxu1 %v1719_v58 }
 0x24e   :  { %1619 = vmatprep.subr.bf16.mxu1 %v1720_v59 }
 0x251   :  { %1620 = vmatpush3.bf16.msra.mxu1 %v1720_v59 }
 0x304   :  { %v1603_v60 = vpop.f32.mrf.mxu1 }
 0x305   :  { %v557_v63 = vmul.f32 0.17677669, %v1603_v60 }
 0x306   :  { %v540_v61 = vpop.f32.mrf.mxu1 }
 0x307   :  { %v555_v0 = vmul.f32 0.17677669, %v540_v61  ;;  %v565_v9 = vadd.f32 %v561_v2, %v557_v63 }
 0x308   :  { %v1604_v1 = vpop.f32.mrf.mxu1 }
 0x309   :  { %v563_v3 = vadd.f32 %v559_v62, %v555_v0  ;;  %v558_v6 = vmul.f32 0.17677669, %v1604_v1  ;;  %v574_v12 = vsel %vm567_vm7, %v565_v9, -inf }
 0x30a   :  { %v543_v4 = vpop.f32.mrf.mxu1 }
 0x30b   :  { %v556_v7 = vmul.f32 0.17677669, %v543_v4  ;;  %v568_v8 = vsel %vm567_vm7, %v563_v3, -inf  ;;  %v566_v14 = vadd.f32 %v562_v10, %v558_v6 }
 0x30c   :  { %569 = vmax.xlane.f32.xlu0 %v568_v8 }
 0x30d   :  { %v564_v11 = vadd.f32 %v560_v5, %v556_v7  ;;  %v577_v15 = vsel %vm567_vm7, %v566_v14, -inf }
 0x30f   :  { %v571_v13 = vsel %vm567_vm7, %v564_v11, -inf }
 0x310   :  { %575 = vmax.xlane.f32.xlu0 %v574_v12  ;;  %572 = vmax.xlane.f32.xlu1 %v571_v13 }
 0x314   :  { %578 = vmax.xlane.f32.xlu0 %v577_v15 }
 0x395   :  { %v570_v16 = vpop.xlane.xlu0 %569 }
 0x396   :  { %v580_v17 = vsub.f32 %v563_v3, %v570_v16 }
 0x398   :  { %v584_v19 = vmul.f32 1.442695, %v580_v17  ;;  %v1825_v17 = vmov 0.0  }
 0x399   :  { %v576_v21 = vpop.xlane.xlu0 %575  ;;  %v573_v22 = vpop.xlane.xlu1 %572 }
 0x39a   :  { %1737 = vpow2.f32 %v584_v19  ;;  %v582_v23 = vsub.f32 %v565_v9, %v576_v21  ;;  %v581_v24 = vsub.f32 %v564_v11, %v573_v22  ;;  %v1936_v19 = vsel %vm58_vm12, 1.0, %v1825_v17 }
 0x39b   :  { %v1939_v21 = vsel %vm56_vm11, 1.0, %v1825_v17  ;;  %vm1376_vm11 = vcmp.eq.s32.totalorder %v1869_v20, 2 }
 0x39c   :  { %v588_v25 = vmul.f32 1.442695, %v582_v23  ;;  %v586_v26 = vmul.f32 1.442695, %v581_v24 }
 0x39d   :  { %v579_v27 = vpop.xlane.xlu0 %578 }
 0x39e   :  { %1739 = vpow2.f32 %v588_v25  ;;  %v583_v28 = vsub.f32 %v566_v14, %v579_v27 }
 0x39f   :  { %1741 = vpow2.f32 %v586_v26 }
 0x3a0   :  { %v590_v29 = vmul.f32 1.442695, %v583_v28 }
 0x3a2   :  { %1743 = vpow2.f32 %v590_v29 }
 0x3a7   :  { %v1738_v30 = vpop.eup %1737 }
 0x3a8   :  { %v592_v35 = vsel %vm567_vm7, %v1738_v30, 0.0 }
 0x3a9   :  { %593 = vadd.xlane.f32.xlu1 %v592_v35 }
 0x3ab   :  { %v1740_v36 = vpop.eup %1739 }
 0x3ac   :  { %v1742_v37 = vpop.eup %1741  ;;  %v598_v38 = vsel %vm567_vm7, %v1740_v36, 0.0 }
 0x3ad   :  { %599 = vadd.xlane.f32.xlu1 %v598_v38  ;;  %v595_v39 = vsel %vm567_vm7, %v1742_v37, 0.0 }
 0x3ae   :  { %596 = vadd.xlane.f32.xlu0 %v595_v39 }
 0x3af   :  { %v1744_v40 = vpop.eup %1743 }
 0x3b0   :  { %v601_v41 = vsel %vm567_vm7, %v1744_v40, 0.0 }
 0x3b2   :  { %602 = vadd.xlane.f32.xlu0 %v601_v41 }
 0x432   :  { %v594_v44 = vpop.xlane.xlu1 %593 }
 0x433   :  { %1745 = vrcp.f32 %v594_v44  ;;  %v1721_v44 = vld [vmem:[#allocation2 + $0xd8] sm:$0xff]  }
 0x434   :  { %1625 = vmatprep.subr.bf16.mxu0 %v1721_v44 }
 0x436   :  { %v600_v46 = vpop.xlane.xlu1 %599 }
 0x437   :  { %v597_v45 = vpop.xlane.xlu0 %596 }
 0x438   :  { %1747 = vrcp.f32 %v597_v45  ;;  %v1722_v45 = vld [vmem:[#allocation2 + $0xd0] sm:$0xff]  }
 0x439   :  { %1749 = vrcp.f32 %v600_v46  ;;  %v1723_v46 = vld [vmem:[#allocation2 + $0xc8] sm:$0xff]  }
 0x43b   :  { %v603_v47 = vpop.xlane.xlu0 %602 }
 0x43c   :  { %1751 = vrcp.f32 %v603_v47  ;;  %v1724_v47 = vld [vmem:[#allocation2 + $0xc0] sm:$0xff]  }
 0x440   :  { %v1746_v48 = vpop.eup %1745 }
 0x441   :  { %v608_v50 = vmul.f32 %v1746_v48, %v1738_v30  ;;  %v1725_v48 = vld [vmem:[#allocation2 + $0x118] sm:$0xff]  }
 0x442   :  { %1637 = vmatprep.subr.bf16.mxu1 %v1725_v48 }
 0x445   :  { %v1748_v49 = vpop.eup %1747 }
 0x446   :  { %v609_v51 = vmul.f32 %v1748_v49, %v1742_v37  ;;  %v1750_v52 = vpop.eup %1749  ;;  %v1726_v49 = vld [vmem:[#allocation2 + $0x110] sm:$0xff]  }
 0x447   :  { %v610_v55 = vmul.f32 %v1750_v52, %v1740_v36 }
 0x448   :  { %v612_v53 = vpack.c.bf16 %v609_v51, %v608_v50  ;;  %v1727_v50 = vld [vmem:[#allocation2 + $0x108] sm:$0xff]   ;;  %v1728_v51 = vld [vmem:[#allocation2 + $0x100] sm:$0xff]  }
 0x449   :  { %v1752_v54 = vpop.eup %1751 }
 0x44a   :  { %1609 = vmatprep.mubr.msk.bf16.mxu0 %vm567_vm7, %v612_v53  ;;  %v611_v56 = vmul.f32 %v1752_v54, %v1744_v40 }
 0x44c   :  { %v613_v57 = vpack.c.bf16 %v611_v56, %v610_v55 }
 0x44e   :  { %1610 = vmatmul.mubr.msk.bf16.vlgmr.msra.gmra.mxu0 %vm567_vm7, %v613_v57 }
 0x44f   :  { %1626 = vmatpush3.bf16.msra.mxu0 %v1721_v44  ;;  %v1399_v44 = vsel %vm75_vm15, 1.0, %v1825_v17 }
 0x450   :  { %1627 = vmatprep.subr.bf16.mxu0 %v1722_v45 }
 0x453   :  { %1628 = vmatpush3.bf16.msra.mxu0 %v1722_v45  ;;  %v1401_v45 = vsel %vm77_vm0, 1.0, %v1825_v17 }
 0x454   :  { %1629 = vmatprep.subr.bf16.mxu0 %v1723_v46 }
 0x457   :  { %1630 = vmatpush3.bf16.msra.mxu0 %v1723_v46 }
 0x458   :  { %1631 = vmatprep.subr.bf16.mxu0 %v1724_v47 }
 0x45b   :  { %1632 = vmatpush3.bf16.msra.mxu0 %v1724_v47 }
 0x45c   :  { %1657 = vmatprep.subr.mxu0 %v1825_v17 }
 0x50e   :  { %v1611_v60 = vpop.f32.mrf.mxu0 }
 0x510   :  { %v656_v61 = vpop.f32.mrf.mxu0 }
 0x512   :  { %v1612_v62 = vpop.f32.mrf.mxu0 }
 0x513   :  { %v672_v1 = vpack.c.bf16 %v1612_v62, %v1611_v60 }
 0x514   :  { %v659_v63 = vpop.f32.mrf.mxu0 }
 0x515   :  { %v671_v0 = vpack.c.bf16 %v659_v63, %v656_v61 }
 0x517   :  { %1621 = vmatprep.mubr.msk.bf16.mxu1 %vm272_vm6, %v671_v0 }
 0x518   :  { %1622 = vmatmul.mubr.msk.bf16.vlgmr.msra.gmra.mxu1 %vm272_vm6, %v672_v1 }
 0x519   :  { %1638 = vmatpush3.bf16.msra.mxu1 %v1725_v48 }
 0x51a   :  { %1639 = vmatprep.subr.bf16.mxu1 %v1726_v49 }
 0x51d   :  { %1640 = vmatpush3.bf16.msra.mxu1 %v1726_v49 }
 0x51e   :  { %1641 = vmatprep.subr.bf16.mxu1 %v1727_v50 }
 0x521   :  { %1642 = vmatpush3.bf16.msra.mxu1 %v1727_v50 }
 0x522   :  { %1643 = vmatprep.subr.bf16.mxu1 %v1728_v51 }
 0x525   :  { %1644 = vmatpush3.bf16.msra.mxu1 %v1728_v51 }
 0x5d8   :  { %v1623_v2 = vpop.f32.mrf.mxu1 }
 0x5d9   :  { %v762_v6 = vadd.f32 %v1623_v2, %v1875_v31 }
 0x5da   :  { %v745_v3 = vpop.f32.mrf.mxu1 }
 0x5db   :  { %v760_v4 = vadd.f32 %v745_v3, %v1877_v32  ;;  %v771_v11 = vsel %vm272_vm6, %v762_v6, 0.0 }
 0x5dc   :  { %v1624_v5 = vpop.f32.mrf.mxu1 }
 0x5dd   :  { %v765_v7 = vsel %vm272_vm6, %v760_v4, 0.0  ;;  %v763_v10 = vadd.f32 %v1624_v5, %v1879_v33 }
 0x5de   :  { %766 = vadd.xlane.f32.xlu1 %v765_v7  ;;  %v748_v8 = vpop.f32.mrf.mxu1 }
 0x5df   :  { %v761_v9 = vadd.f32 %v748_v8, %v1881_v34  ;;  %v774_v13 = vsel %vm272_vm6, %v763_v10, 0.0 }
 0x5e1   :  { %v768_v12 = vsel %vm272_vm6, %v761_v9, 0.0 }
 0x5e2   :  { %772 = vadd.xlane.f32.xlu1 %v771_v11  ;;  %769 = vadd.xlane.f32.xlu0 %v768_v12 }
 0x5e6   :  { %775 = vadd.xlane.f32.xlu0 %v774_v13 }
 0x667   :  { %v767_v31 = vpop.xlane.xlu1 %766 }
 0x668   :  { %v777_v32 = vmul.f32 0.03125, %v767_v31 }
 0x66a   :  { %v781_v14 = vsub.f32 %v760_v4, %v777_v32 }
 0x66b   :  { %v773_v33 = vpop.xlane.xlu1 %772  ;;  %v770_v34 = vpop.xlane.xlu0 %769 }
 0x66c   :  { %v779_v15 = vmul.f32 0.03125, %v773_v33  ;;  %v778_v16 = vmul.f32 0.03125, %v770_v34  ;;  %v1944_v28 = vmul.f32 %v1939_v21, %v781_v14 }
 0x66e   :  { %v783_v22 = vsub.f32 %v762_v6, %v779_v15  ;;  %v782_v23 = vsub.f32 %v761_v9, %v778_v16  ;;  %v789_v38 = vmul.f32 %v1944_v28, %v1944_v28 }
 0x66f   :  { %v776_v24 = vpop.xlane.xlu0 %775 }
 0x670   :  { %v780_v25 = vmul.f32 0.03125, %v776_v24  ;;  %v787_v26 = vmul.f32 %v1936_v19, %v783_v22  ;;  %v786_v27 = vmul.f32 %v1939_v21, %v782_v23  ;;  %v793_v41 = vsel %vm272_vm6, %v789_v38, 0.0  ;;  %v1729_v24 = vld [vmem:[#allocation2 + $0xf8] sm:$0xff]  }
 0x671   :  { %1645 = vmatprep.subr.bf16.mxu1 %v1729_v24 }
 0x672   :  { %v784_v29 = vsub.f32 %v763_v10, %v780_v25  ;;  %v791_v30 = vmul.f32 %v787_v26, %v787_v26  ;;  %v790_v35 = vmul.f32 %v786_v27, %v786_v27  ;;  %1646 = vmatpush3.bf16.msra.mxu1 %v1729_v24  ;;  %v1730_v25 = vld [vmem:[#allocation2 + $0xf0] sm:$0xff]  }
 0x673   :  { %1647 = vmatprep.subr.bf16.mxu1 %v1730_v25 }
 0x674   :  { %v799_v36 = vsel %vm272_vm6, %v791_v30, 0.0  ;;  %v796_v37 = vsel %vm272_vm6, %v790_v35, 0.0  ;;  %v788_v39 = vmul.f32 %v1936_v19, %v784_v29  ;;  %v1448_v29 = vld [vmem:[%s2055_s2 + $0x22] ss:$0 sm:$0xff] }
 0x675   :  { %800 = vadd.xlane.f32.xlu1 %v799_v36  ;;  %797 = vadd.xlane.f32.xlu0 %v796_v37 }
 0x676   :  { %v792_v40 = vmul.f32 %v788_v39, %v788_v39  ;;  %1648 = vmatpush3.bf16.msra.mxu1 %v1730_v25 }
 0x678   :  { %v802_v42 = vsel %vm272_vm6, %v792_v40, 0.0 }
 0x679   :  { %794 = vadd.xlane.f32.xlu1 %v793_v41  ;;  %803 = vadd.xlane.f32.xlu0 %v802_v42 }
 0x68a   :  { %830 = vrot.lane.b32.xlu1 %v1447_v43, %s1820_s15 }
 0x6fe   :  { %v801_v52 = vpop.xlane.xlu1 %800  ;;  %v798_v53 = vpop.xlane.xlu0 %797 }
 0x6ff   :  { %v807_v54 = vmul.f32 0.03125, %v801_v52  ;;  %v806_v55 = vmul.f32 0.03125, %v798_v53  ;;  %v1455_v53 = vld [vmem:[%s2055_s2 + $0x23] ss:$0 sm:$0xff] }
 0x701   :  { %v811_v56 = vadd.f32 1e-05, %v807_v54  ;;  %v810_v57 = vadd.f32 1e-05, %v806_v55 }
 0x702   :  { %v795_v58 = vpop.xlane.xlu1 %794  ;;  %v804_v59 = vpop.xlane.xlu0 %803 }
 0x703   :  { %1753 = vrsqrt.f32 %v811_v56  ;;  %v805_v60 = vmul.f32 0.03125, %v795_v58  ;;  %v808_v61 = vmul.f32 0.03125, %v804_v59 }
 0x704   :  { %1755 = vrsqrt.f32 %v810_v57 }
 0x705   :  { %v809_v62 = vadd.f32 1e-05, %v805_v60  ;;  %v812_v63 = vadd.f32 1e-05, %v808_v61 }
 0x706   :  { %v831_v6 = vpop.permute.xlu1 %830 }
 0x707   :  { %1757 = vrsqrt.f32 %v809_v62 }
 0x708   :  { %1759 = vrsqrt.f32 %v812_v63 }
 0x710   :  { %v1754_v0 = vpop.eup %1753 }
 0x711   :  { %v1756_v1 = vpop.eup %1755  ;;  %v819_v2 = vmul.f32 %v1754_v0, %v787_v26  ;;  %v1731_v26 = vld [vmem:[#allocation2 + $0xe8] sm:$0xff]  }
 0x712   :  { %v818_v3 = vmul.f32 %v1756_v1, %v786_v27  ;;  %1649 = vmatprep.subr.bf16.mxu1 %v1731_v26  ;;  %v1732_v27 = vld [vmem:[#allocation2 + $0xe0] sm:$0xff]  }
 0x713   :  { %v827_v5 = vmul.f32 %v1447_v43, %v819_v2  ;;  %1650 = vmatpush3.bf16.msra.mxu1 %v1731_v26 }
 0x714   :  { %v1758_v4 = vpop.eup %1757  ;;  %v826_v7 = vmul.f32 %v1447_v43, %v818_v3  ;;  %1651 = vmatprep.subr.bf16.mxu1 %v1732_v27 }
 0x715   :  { %v1760_v8 = vpop.eup %1759  ;;  %v817_v9 = vmul.f32 %v1758_v4, %v1944_v28  ;;  %v835_v31 = vadd.f32 %v831_v6, %v827_v5 }
 0x716   :  { %v820_v10 = vmul.f32 %v1760_v8, %v788_v39  ;;  %v834_v12 = vadd.f32 %v831_v6, %v826_v7 }
 0x717   :  { %v825_v11 = vmul.f32 %v1447_v43, %v817_v9  ;;  %v839_v15 = vmul.f32 %v1936_v19, %v835_v31  ;;  %1652 = vmatpush3.bf16.msra.mxu1 %v1732_v27 }
 0x718   :  { %v828_v13 = vmul.f32 %v1447_v43, %v820_v10  ;;  %v1963_v14 = vmul.f32 %v1939_v21, %v834_v12 }
 0x719   :  { %v833_v32 = vadd.f32 %v831_v6, %v825_v11 }
 0x71a   :  { %v836_v33 = vadd.f32 %v831_v6, %v828_v13 }
 0x71b   :  { %v1960_v34 = vmul.f32 %v1939_v21, %v833_v32 }
 0x71c   :  { %v840_v16 = vmul.f32 %v1936_v19, %v836_v33 }
 0x71d   :  { %v841_v22 = vpack.c.bf16 %v1963_v14, %v1960_v34 }
 0x71e   :  { %v842_v23 = vpack.c.bf16 %v840_v16, %v839_v15 }
 0x71f   :  { %1633 = vmatprep.mubr.msk.bf16.mxu0 %vm272_vm6, %v841_v22 }
 0x720   :  { %1634 = vmatmul.mubr.msk.bf16.vlgmr.msra.gmra.mxu0 %vm272_vm6, %v842_v23 }
 0x721   :  { %1665 = vmatprep.mubr.msk.f32.mxu0 %vm1827_vm1, %v1825_v17 }
 0x7e0   :  { %v1635_v28 = vpop.f32.mrf.mxu0 }
 0x7e1   :  { %v929_v36 = vadd.f32 %v1635_v28, %v1448_v29 }
 0x7e2   :  { %v920_v30 = vpop.f32.mrf.mxu0 }
 0x7e3   :  { %v921_v35 = vadd.f32 %v1448_v29, %v920_v30  ;;  %v937_v43 = vmax.f32 %v929_v36, 0.0 }
 0x7e4   :  { %v1636_v37 = vpop.f32.mrf.mxu0 }
 0x7e5   :  { %v932_v38 = vadd.f32 %v1636_v37, %v1448_v29  ;;  %v935_v40 = vmax.f32 %v921_v35, 0.0  ;;  %v941_v50 = vmul.f32 %v1401_v45, %v937_v43 }
 0x7e6   :  { %v923_v39 = vpop.f32.mrf.mxu0 }
 0x7e7   :  { %v938_v41 = vmax.f32 %v932_v38, 0.0  ;;  %v924_v42 = vadd.f32 %v1448_v29, %v923_v39  ;;  %v939_v48 = vmul.f32 %v1399_v44, %v935_v40  ;;  %v1464_v39 = vld [vmem:[%s2055_s2 + $0x21] ss:$0 sm:$0xff] }
 0x7e8   :  { %v1148_v40 = vld [vmem:[%s2055_s2] sm:$0xf] }
 0x7e9   :  { %v936_v46 = vmax.f32 %v924_v42, 0.0  ;;  %v942_v47 = vmul.f32 %v1401_v45, %v938_v41 }
 0x7eb   :  { %v940_v49 = vmul.f32 %v1399_v44, %v936_v46  ;;  %v944_v52 = vpack.c.bf16 %v942_v47, %v941_v50 }
 0x7ed   :  { %v943_v51 = vpack.c.bf16 %v940_v49, %v939_v48 }
 0x7ef   :  { %1653 = vmatprep.mubr.bf16.mxu1 %v943_v51 }
 0x7f0   :  { %1654 = vmatmul.mubr.bf16.vlgmr.msra.gmra.mxu1 %v944_v52 }
 0x8b0   :  { %v1655_v54 = vpop.f32.mrf.mxu1 }
 0x8b1   :  { %v1057_v55 = vadd.f32 %v1655_v54, %v1455_v53 }
 0x8b2   :  { %v1048_v56 = vpop.f32.mrf.mxu1 }
 0x8b3   :  { %v1065_v57 = vmul.f32 %v1936_v19, %v1057_v55  ;;  %v1049_v62 = vadd.f32 %v1455_v53, %v1048_v56 }
 0x8b4   :  { %v1656_v58 = vpop.f32.mrf.mxu1 }
 0x8b5   :  { %v1060_v59 = vadd.f32 %v1656_v58, %v1455_v53  ;;  %v1069_v60 = vadd.f32 %v1065_v57, %v839_v15  ;;  %v1063_v4 = vmul.f32 %v1939_v21, %v1049_v62 }
 0x8b6   :  { %v1051_v61 = vpop.f32.mrf.mxu1 }
 0x8b7   :  { %v1066_v63 = vmul.f32 %v1936_v19, %v1060_v59  ;;  %v1052_v0 = vadd.f32 %v1455_v53, %v1051_v61  ;;  %v1078_v1 = vsel %vm272_vm6, %v1069_v60, 0.0  ;;  %v1067_v8 = vadd.f32 %v1063_v4, %v1960_v34 }
 0x8b8   :  { %1079 = vadd.xlane.f32.xlu0 %v1078_v1 }
 0x8b9   :  { %v1064_v2 = vmul.f32 %v1939_v21, %v1052_v0  ;;  %v1070_v3 = vadd.f32 %v1066_v63, %v840_v16  ;;  %v1072_v9 = vsel %vm272_vm6, %v1067_v8, 0.0 }
 0x8bb   :  { %v1081_v5 = vsel %vm272_vm6, %v1070_v3, 0.0  ;;  %v1068_v6 = vadd.f32 %v1064_v2, %v1963_v14 }
 0x8bc   :  { %1082 = vadd.xlane.f32.xlu0 %v1081_v5 }
 0x8bd   :  { %v1075_v7 = vsel %vm272_vm6, %v1068_v6, 0.0 }
 0x8c0   :  { %1076 = vadd.xlane.f32.xlu0 %v1075_v7 }
 0x8c4   :  { %1073 = vadd.xlane.f32.xlu0 %v1072_v9 }
 0x941   :  { %v1080_v10 = vpop.xlane.xlu0 %1079 }
 0x942   :  { %v1086_v11 = vmul.f32 0.03125, %v1080_v10 }
 0x944   :  { %v1090_v12 = vsub.f32 %v1069_v60, %v1086_v11  ;;  %v1733_v11 = vld [vmem:[#allocation2 + $0x138] sm:$0xff]  }
 0x945   :  { %v1083_v13 = vpop.xlane.xlu0 %1082 }
 0x946   :  { %v1087_v31 = vmul.f32 0.03125, %v1083_v13  ;;  %v1094_v32 = vmul.f32 %v1936_v19, %v1090_v12  ;;  %v1735_v12 = vld [vmem:[#allocation2 + $0x128] sm:$0xff]  }
 0x948   :  { %v1091_v33 = vsub.f32 %v1070_v3, %v1087_v31  ;;  %v1098_v15 = vmul.f32 %v1094_v32, %v1094_v32 }
 0x949   :  { %v1077_v16 = vpop.xlane.xlu0 %1076 }
 0x94a   :  { %v1085_v14 = vmul.f32 0.03125, %v1077_v16  ;;  %v1106_v22 = vsel %vm272_vm6, %v1098_v15, 0.0  ;;  %v1095_v23 = vmul.f32 %v1936_v19, %v1091_v33  ;;  %v31_v33 = vshrl.u32 %v30_v18, 7  ;;  %v1466_v15 = vld [vmem:[%s2055_s2 + $0x24] ss:$0 sm:$0xff]  ;;  %s1828_s2 = smov 126  }
 0x94b   :  { %1107 = vadd.xlane.f32.xlu0 %v1106_v22 }
 0x94c   :  { %v1099_v34 = vmul.f32 %v1095_v23, %v1095_v23  ;;  %v1089_v25 = vsub.f32 %v1068_v6, %v1085_v14  ;;  %vm1305_vm2 = vcmp.ge.s32.totalorder %v31_v33, 2 }
 0x94d   :  { %v1074_v24 = vpop.xlane.xlu0 %1073  ;;  %vm1311_vm4 = vmxor %vm1305_vm2, %vm1306_vm3 }
 0x94e   :  { %v1084_v26 = vmul.f32 0.03125, %v1074_v24  ;;  %v1109_v27 = vsel %vm272_vm6, %v1099_v34, 0.0  ;;  %v1093_v30 = vmul.f32 %v1939_v21, %v1089_v25  ;;  %vm2031_vm5 = vmxor %vm1311_vm4, %vm1824_vm9  ;;  %vm1358_vm9 = vcmp.eq.s32.totalorder %v1869_v20, 0 }
 0x94f   :  { %1110 = vadd.xlane.f32.xlu1 %v1109_v27 }
 0x950   :  { %v1088_v28 = vsub.f32 %v1067_v8, %v1084_v26  ;;  %v1097_v37 = vmul.f32 %v1093_v30, %v1093_v30  ;;  %v1313_v26 = vld [vmem:[%s2053_s0 + $0x20] sm:$0xf]  ;;  %s1830_s0 = smov [#allocation5]  }
 0x951   :  { %s1386_s22 = sshll.u32 %s1830_s0, 4  ;;  %s1387_s22 = int_to_ptr.vmem [resolvable:$true] %s1386_s22 }
 0x952   :  { %v1092_v29 = vmul.f32 %v1939_v21, %v1088_v28  ;;  %v1103_v38 = vsel %vm272_vm6, %v1097_v37, 0.0  ;;  %s1795_s23 = scalar_lea.vmem %s1387_s22, 32  ;;  %p1800_p6 = scmp.lt.s32.totalorder %s1387_s22, %s1387_s22 }
 0x953   :  { %p1796_p5 = scmp.ne.s32.totalorder %s1387_s22, %s1795_s23  ;;  %p1801_p7 = scmp.lt.s32.totalorder %s1795_s23, %s1795_s23 }
 0x954   :  { %v1096_v35 = vmul.f32 %v1092_v29, %v1092_v29 }
 0x955   :  { %p1802_p8 = por %p1801_p7, %p1800_p6 }
 0x956   :  { %v1100_v36 = vsel %vm272_vm6, %v1096_v35, 0.0 }
 0x957   :  { %1101 = vadd.xlane.f32.xlu0 %v1100_v36  ;;  %p1803_p9 = pnand %p1802_p8, %p1796_p5 }
 0x95b   :  { %1104 = vadd.xlane.f32.xlu0 %v1103_v38 }
 0x971   :  { %1137 = vrot.lane.b32.xlu0 %v1464_v39, %s1820_s15 }
 0x975   :  { %1150 = vrot.lane.b32.xlu0 %v1148_v40, %s1826_s18 }
 0x9d4   :  { %v1108_v41 = vpop.xlane.xlu0 %1107 }
 0x9d5   :  { %v1114_v42 = vmul.f32 0.03125, %v1108_v41 }
 0x9d7   :  { %v1118_v43 = vadd.f32 1e-05, %v1114_v42 }
 0x9d8   :  { %v1111_v44 = vpop.xlane.xlu1 %1110 }
 0x9d9   :  { %1761 = vrsqrt.f32 %v1118_v43  ;;  %v1115_v45 = vmul.f32 0.03125, %v1111_v44 }
 0x9db   :  { %v1119_v46 = vadd.f32 1e-05, %v1115_v45 }
 0x9dd   :  { %1763 = vrsqrt.f32 %v1119_v46 }
 0x9e0   :  { %v1102_v47 = vpop.xlane.xlu0 %1101 }
 0x9e1   :  { %v1112_v48 = vmul.f32 0.03125, %v1102_v47 }
 0x9e3   :  { %v1116_v49 = vadd.f32 1e-05, %v1112_v48 }
 0x9e4   :  { %v1105_v50 = vpop.xlane.xlu0 %1104 }
 0x9e5   :  { %1765 = vrsqrt.f32 %v1116_v49  ;;  %v1113_v51 = vmul.f32 0.03125, %v1105_v50 }
 0x9e6   :  { %v1762_v52 = vpop.eup %1761 }
 0x9e7   :  { %v1117_v53 = vadd.f32 1e-05, %v1113_v51  ;;  %v1126_v54 = vmul.f32 %v1762_v52, %v1094_v32  ;;  %v1829_v51 = vmov 1  }
 0x9e8   :  { %v1138_v58 = vpop.permute.xlu0 %1137 }
 0x9e9   :  { %1767 = vrsqrt.f32 %v1117_v53  ;;  %v1134_v57 = vmul.f32 %v1464_v39, %v1126_v54 }
 0x9ea   :  { %v1764_v55 = vpop.eup %1763 }
 0x9eb   :  { %v1127_v56 = vmul.f32 %v1764_v55, %v1095_v23  ;;  %v1142_v60 = vadd.f32 %v1138_v58, %v1134_v57 }
 0x9ec   :  { %v1151_v10 = vpop.permute.xlu0 %1150 }
 0x9ed   :  { %v1135_v59 = vmul.f32 %v1464_v39, %v1127_v56  ;;  %v1146_v1 = vmul.f32 %v1936_v19, %v1142_v60 }
 0x9ef   :  { %v1143_v61 = vadd.f32 %v1138_v58, %v1135_v59 }
 0x9f1   :  { %v1147_v62 = vmul.f32 %v1936_v19, %v1143_v61  ;;  %v1734_v19 = vld [vmem:[#allocation2 + $0x130] sm:$0xff]  }
 0x9f2   :  { %v1766_v63 = vpop.eup %1765 }
 0x9f3   :  { %v1124_v0 = vmul.f32 %v1766_v63, %v1092_v29  ;;  %1658 = vmatpush3.msra.mxu0 %v1147_v62 }
 0x9f4   :  { %1659 = vmatprep.subr.mxu0 %v1825_v17 }
 0x9f5   :  { %1660 = vmatpush3.msra.mxu0 %v1146_v1  ;;  %v1132_v4 = vmul.f32 %v1464_v39, %v1124_v0 }
 0x9f6   :  { %v1768_v2 = vpop.eup %1767  ;;  %1661 = vmatprep.subr.mxu0 %v1825_v17 }
 0x9f7   :  { %v1125_v3 = vmul.f32 %v1768_v2, %v1093_v30  ;;  %v1140_v6 = vadd.f32 %v1138_v58, %v1132_v4 }
 0x9f9   :  { %v1133_v5 = vmul.f32 %v1464_v39, %v1125_v3  ;;  %v1144_v9 = vmul.f32 %v1939_v21, %v1140_v6 }
 0x9fb   :  { %v1141_v7 = vadd.f32 %v1138_v58, %v1133_v5 }
 0x9fd   :  { %v1145_v8 = vmul.f32 %v1939_v21, %v1141_v7  ;;  %v1736_v21 = vld [vmem:[#allocation2 + $0x120] sm:$0xff]  }
 0x9ff   :  { %1662 = vmatpush3.msra.mxu0 %v1145_v8 }
 0xa00   :  { %1663 = vmatprep.subr.mxu0 %v1825_v17 }
 0xa01   :  { %1664 = vmatpush3.msra.mxu0 %v1144_v9 }
 0xa02   :  { %1666 = vmatmul.mubr.msk.f32.vlgmr.msra.gmra.mxu0 %vm567_vm7, %v1151_v10  ;;  %1668 = vmatprep.subr.bf16.mxu0 %v1825_v17  ;;  %vm1321_vm7 = vcmask 27648  }
 0xa03   :  { %1669 = vmatpush3.bf16.msra.mxu0 %v1733_v11  ;;  %1676 = vmatprep.mubr.msk.bf16.mxu0 %vm1827_vm1, %v1825_v17 }
 0xa04   :  { %1670 = vmatprep.subr.bf16.mxu0 %v1825_v17 }
 0xa07   :  { %1671 = vmatpush3.bf16.msra.mxu0 %v1734_v19 }
 0xa08   :  { %1672 = vmatprep.subr.bf16.mxu0 %v1825_v17 }
 0xa0b   :  { %1673 = vmatpush3.bf16.msra.mxu0 %v1735_v12 }
 0xa0c   :  { %1674 = vmatprep.subr.bf16.mxu0 %v1825_v17 }
 0xa0f   :  { %1675 = vmatpush3.bf16.msra.mxu0 %v1736_v21 }
 0xac2   :  { %v1220_v13 = vpop.f32.mrf.mxu0 }
 0xac3   :  { %v1224_v31 = vpack.c.bf16 %v1220_v13, %v1220_v13 }
 0xac4   :  { %v1667_v32 = vpop.f32.mrf.mxu0 }
 0xac5   :  { %1677 = vmatmul.mubr.msk.bf16.vlgmr.msra.gmra.mxu0 %vm272_vm6, %v1224_v31 }
 0xb85   :  { %v1299_v16 = vpop.f32.mrf.mxu0 }
 0xb86   :  { %v1300_v22 = vadd.f32 %v1466_v15, %v1299_v16 }
 0xb87   :  { %v1678_v23 = vpop.f32.mrf.mxu0 }
 0xb88   :  { %v1320_v18 = vsel %vm2031_vm5, %v1300_v22, -1e+30 }
 0xb89   :  { %v1302_v34 = vpop.f32.mrf.mxu0  ;;  %v1322_v24 = vsel %vm1321_vm7, %v1320_v18, -inf }
 0xb8a   :  { %1323 = vmax.xlane.f32.xlu1 %v1322_v24 }
 0xb8b   :  { %v1679_v25 = vpop.f32.mrf.mxu0 }
 0xb9b   :  { %1315 = vperm.xlu1 %1695, %v1313_v26  }
 0xc13   :  { %v1324_v27 = vpop.xlane.xlu1 %1323 }
 0xc14   :  { %v1325_v28 = vsub.f32 %v1320_v18, %v1324_v27 }
 0xc16   :  { %v1326_v29 = vmul.f32 1.442695, %v1325_v28 }
 0xc17   :  { %v1316_v43 = vpop.permute.xlu1 %1315 }
 0xc18   :  { %1769 = vpow2.f32 %v1326_v29  ;;  %vm1317_vm6 = vcmp.eq.s32.totalorder %v1869_v20, %v1316_v43 }
 0xc19   :  { %v1472_v45 = vsel %vm1317_vm6, 1.0, %v1825_v17 }
 0xc25   :  { %v1770_v30 = vpop.eup %1769 }
 0xc26   :  { %v1328_v35 = vsel %vm2031_vm5, %v1770_v30, 0.0 }
 0xc27   :  { %v1329_v36 = vsel %vm1321_vm7, %v1328_v35, 0.0 }
 0xc28   :  { %1330 = vadd.xlane.f32.xlu0 %v1329_v36 }
 0xcb1   :  { %v1331_v37 = vpop.xlane.xlu0 %1330 }
 0xcb2   :  { %1771 = vrcp.f32 %v1331_v37 }
 0xcb3   :  { %1773 = vlog2.f32 %v1331_v37 }
 0xcbf   :  { %v1772_v38 = vpop.eup %1771 }
 0xcc0   :  { %v1333_v39 = vmul.f32 %v1772_v38, %v1328_v35  ;;  %v1774_v41 = vpop.eup %1773 }
 0xcc1   :  { %v1335_v42 = vmul.f32 0.6931472, %v1774_v41 }
 0xcc2   :  { %v1352_v40 = vrot.slane %v1333_v39, 2 }
 0xcc3   :  { %v1336_v44 = vsub.f32 %v1325_v28, %v1335_v42 }
 0xcc4   :  { %1353 = vrot.lane.b32.xlu1 %v1352_v40, %s1828_s2 }
 0xcc5   :  { %v1337_v46 = vmul.f32 %v1472_v45, %v1336_v44 }
 0xcc7   :  { %v1338_v47 = vsel %vm1321_vm7, %v1337_v46, 0.0 }
 0xce8   :  { %1339 = vadd.xlane.f32.xlu1 %v1338_v47 }
 0xd36   :  { %v1354_v48 = vpop.permute.xlu1 %1353 }
 0xd37   :  { %v1356_v49 = vadd.f32 %v1354_v48, %v1333_v39 }
 0xd39   :  { %v1357_v50 = vmul.f32 0.5, %v1356_v49 }
 0xd3b   :  { %1363 = vperm.xlu0 %1694, %v1357_v50  }
 0xd3f   :  { %1696 = vset.pattern.permute.xlu0 %v1829_v51 }
 0xd40   :  { %1371 = vperm.xlu0 %1696, %v1357_v50  }
 0xd71   :  { %v1340_v52 = vpop.xlane.xlu1 %1339 }
 0xd72   :  { %v1341_v53 = vsub.f32 0.0, %v1340_v52 }
 0xd74   :  { %v1343_v54 = vsel %vm1342_vm8, %v1341_v53, 0.0 }
 0xd75   :  { %v1344_v55 = vrot.slane %v1343_v54, 4 }
 0xd77   :  { %v1345_v56 = vadd.f32 %v1344_v55, %v1343_v54 }
 0xd79   :  { %v1346_v57 = vrot.slane %v1345_v56, 2 }
 0xd7b   :  { %v1347_v58 = vadd.f32 %v1346_v57, %v1345_v56 }
 0xd7d   :  { %v1348_v17 = vrot.slane %v1347_v58, 1 }
 0xd7f   :  { %v1349_v59 = vadd.f32 %v1348_v17, %v1347_v58 }
 0xd81   :  { %v1350_v61 = vmul.f32 0.25, %v1349_v59 }
 0xd83   :  { %v1377_v2 = vsel %vm1376_vm11, %v1350_v61, 0.0 }
 0xdb6   :  { %v1364_v60 = vpop.permute.xlu0 %1363 }
 0xdb7   :  { %v1366_v63 = vsel %vm1358_vm9, %v1364_v60, 0.0 }
 0xdbb   :  { %v1372_v62 = vpop.permute.xlu0 %1371 }
 0xdbc   :  { %v1374_v0 = vsel %vm1367_vm10, %v1372_v62, 0.0 }
 0xdbd   :  { %v1375_v1 = vadd.f32 %v1374_v0, %v1366_v63 }
 0xdbf   :  { %v1378_v3 = vadd.f32 %v1377_v2, %v1375_v1 }
 0xdc1   :  { %1379 = vst [vmem:[#allocation5] sm:$0x3] %v1378_v3 }
 0xdc2   :  { %1806 = shalt.err (!%p1803_p9)
}
 0xdc3   :  { %1389 = dma.vmem_to_hbm [thread:$0]  %s1387_s22, 32, %s2056_s3, [#allocation4]  }
 0xdc4   :  { %1817 = dma.done.wait [#allocation4], 32  }
 0xdc5   :  { %1818 = vsyncadd [#allocation4], 4294967264 }
 0xdc6   :  { %1393 = vsyncpa [#allocation3], 1 }
 0xdc7   :  { %1394 = vsyncpa [#allocation4], 1 }

</bundles_post_ra>
